<compile_context>
chip_gen: v5e
topology: v5e:2x2
jax: 0.10.0
libtpu: 0.0.40
codegen_flags: <defaults>
</compile_context>

<pallas_src>
import math
from functools import partial

import jax
import jax.numpy as jnp
from jax.experimental import pallas as pl
from jax.experimental.pallas import tpu as pltpu

_HALF_LOG_2PI = 0.5 * math.log(2.0 * math.pi)


# ----------------------------------------------------------------------------- helpers
def _cdiv(a: int, b: int) -> int:
    return -(-a // b)


def _round_up(n: int, m: int) -> int:
    return _cdiv(n, m) * m


def _pad2d(a: jax.Array, rows: int, cols: int) -> jax.Array:
    pr, pc = rows - a.shape[0], cols - a.shape[1]
    if pr or pc:
        a = jnp.pad(a, ((0, pr), (0, pc)))
    return a


def _vmem_cap_bytes() -> int:
    """Generation-aware scoped-VMEM cap (~75% of physical; 48 MiB on v7x, 96 MiB on v5e/v6e)."""
    try:
        cap = int(getattr(pltpu.get_tpu_info(), "vmem_capacity_bytes", 64 << 20))
    except Exception:  # CPU interpret / unknown backend
        cap = 64 << 20
    return max(16 << 20, min((cap * 3) // 4, 112 << 20))


def _vmem_limit_bytes(double_buffered_bytes: int, single_bytes: int = 0) -> int:
    est = 2 * double_buffered_bytes + single_bytes + (2 << 20)
    return int(min(max(est, 8 << 20), _vmem_cap_bytes()))


def _pick_batch_tiles(B: int, tb_max: int, align: int, min_tiles: int = 2):
    """Pad B to `align`, then pick TB so padding waste is small and (when possible)
    there are >= min_tiles grid points on the parallel batch axis (v7x: 2 TCs)."""
    Bpa = _round_up(max(B, 1), align)
    tb_max = max(align, (tb_max // align) * align)
    n = max(min_tiles, _cdiv(Bpa, tb_max))
    n = max(1, min(n, Bpa // align))
    TB = min(_round_up(_cdiv(Bpa, n), align), tb_max)
    grid_b = _cdiv(Bpa, TB)
    return TB, grid_b * TB, grid_b


# ----------------------------------------------------------------------------- fused MLP encoder + Gaussian head
def _fused_encoder_kernel(x_ref, w1_ref, b1_ref, w2_ref, b2_ref,
                          w3m_ref, b3m_ref, w3s_ref, b3s_ref,
                          mean_ref, std_ref, logstd_ref):
    f32 = jnp.float32
    bf16 = jnp.bfloat16

    # Layer 1: (TB, D) @ (D, H) on the MXU (bf16 operands, f32 accumulate).
    h1 = jnp.dot(x_ref[...], w1_ref[...], preferred_element_type=f32)
    h1 = jnp.maximum(h1 + b1_ref[...].astype(f32), 0.0)

    # Layer 2.
    h2 = jnp.dot(h1.astype(bf16), w2_ref[...], preferred_element_type=f32)
    h2 = jnp.maximum(h2 + b2_ref[...].astype(f32), 0.0)
    h2b = h2.astype(bf16)

    # Layer 3, already split into mean / log_std column halves (no lane-offset chunk).
    mean = jnp.dot(h2b, w3m_ref[...], preferred_element_type=f32) + b3m_ref[...].astype(f32)
    log_std = jnp.dot(h2b, w3s_ref[...], preferred_element_type=f32) + b3s_ref[...].astype(f32)

    mean_ref[...] = mean.astype(mean_ref.dtype)
    logstd_ref[...] = log_std.astype(logstd_ref.dtype)
    std_ref[...] = jnp.exp(log_std).astype(std_ref.dtype)   # EUP slot, free under the dots


def gaussian_encode_pallas(x2d, w1, b1, w2, b2, w3, b3, M, *, tb_max=512):
    """x2d:(B,D) -> (mean:(B,M), std:(B,M), log_std:(B,M)) in one pallas_call."""
    B, D = x2d.shape
    H = w1.shape[1]
    assert w1.shape == (D, H) and b1.shape == (H,)
    assert w2.shape == (H, H) and b2.shape == (H,)
    assert w3.shape == (H, 2 * M) and b3.shape == (2 * M,)

    bf16 = jnp.bfloat16
    Dp, Hp = _round_up(D, 128), _round_up(H, 128)
    TB, Bp, grid_b = _pick_batch_tiles(B, tb_max, align=16, min_tiles=2)

    xb = _pad2d(x2d, Bp, Dp).astype(bf16)
    w1b = _pad2d(w1, Dp, Hp).astype(bf16)
    w2b = _pad2d(w2, Hp, Hp).astype(bf16)
    w3m = _pad2d(w3[:, :M], Hp, M).astype(bf16)
    w3s = _pad2d(w3[:, M:], Hp, M).astype(bf16)
    b1r = _pad2d(b1.reshape(1, H).astype(jnp.float32), 1, Hp)
    b2r = _pad2d(b2.reshape(1, H).astype(jnp.float32), 1, Hp)
    b3m = b3[:M].reshape(1, M).astype(jnp.float32)
    b3s = b3[M:].reshape(1, M).astype(jnp.float32)

    # Pipelined (double-buffered) bytes vs single-buffered intermediates.
    db = (TB * Dp * 2                                   # x tile (bf16)
          + (Dp * Hp + Hp * Hp + 2 * Hp * M) * 2        # weights (bf16, VMEM-resident)
          + (2 * Hp + 2 * M) * 4                        # biases (f32)
          + 3 * TB * M * 4)                             # outputs (f32)
    single = 2 * TB * Hp * 4 + TB * Dp * 4              # h1/h2 temporaries + headroom
    vmem = _vmem_limit_bytes(db, single)

    const = lambda i: (0, 0)
    row = lambda i: (i, 0)

    mean, std, log_std = pl.pallas_call(
        _fused_encoder_kernel,
        out_shape=(jax.ShapeDtypeStruct((Bp, M), jnp.float32),
                   jax.ShapeDtypeStruct((Bp, M), jnp.float32),
                   jax.ShapeDtypeStruct((Bp, M), jnp.float32)),
        grid=(grid_b,),
        in_specs=[
            pl.BlockSpec((TB, Dp), row),     # x batch tile
            pl.BlockSpec((Dp, Hp), const),   # w1 (resident)
            pl.BlockSpec((1, Hp), const),    # b1
            pl.BlockSpec((Hp, Hp), const),   # w2
            pl.BlockSpec((1, Hp), const),    # b2
            pl.BlockSpec((Hp, M), const),    # w3 (mean half)
            pl.BlockSpec((1, M), const),     # b3 (mean half)
            pl.BlockSpec((Hp, M), const),    # w3 (log_std half)
            pl.BlockSpec((1, M), const),     # b3 (log_std half)
        ],
        out_specs=(pl.BlockSpec((TB, M), row),
                   pl.BlockSpec((TB, M), row),
                   pl.BlockSpec((TB, M), row)),
        compiler_params=pltpu.CompilerParams(
            dimension_semantics=("parallel",),
            vmem_limit_bytes=vmem,
        ),
    )(xb, w1b, b1r, w2b, b2r, w3m, b3m, w3s, b3s)
    return mean[:B], std[:B], log_std[:B]


# ----------------------------------------------------------------------------- log_prob of Independent(Normal(mean, exp(log_std)), 1)
def _gaussian_logprob_kernel(z_ref, mean_ref, logstd_ref, out_ref, *, m, g):
    z = z_ref[...].astype(jnp.float32)            # (TR, g*M): g batch rows packed per vreg row
    mean = mean_ref[...].astype(jnp.float32)
    log_std = logstd_ref[...].astype(jnp.float32)

    inv_std = jnp.exp(-log_std)                   # EUP; avoids in-kernel log + divide
    u = (z - mean) * inv_std
    elem = -0.5 * (u * u) - log_std

    tr = elem.shape[0]
    row = jnp.sum(elem.reshape(tr, g, m), axis=-1)        # per-sample segmented sums -> (TR, g)
    row = row - (m * _HALF_LOG_2PI)                        # constant folded once per sample
    out_ref[...] = row.reshape(1, tr * g)                  # lane-dense (1, TB) store


def gaussian_logprob(z, mean, log_std, *, tb_max=2048):
    B, M = z.shape
    assert mean.shape == (B, M) and log_std.shape == (B, M)

    # Pack g batch rows per lane-row when the latent dim under-fills the 128 lanes.
    g = max(1, min(128 // M, 16)) if M < 128 else 1
    tb_align = math.lcm(8 * g, 128)               # TR multiple of 8 AND lane-dense output rows
    TB, Bp, G = _pick_batch_tiles(B, tb_max, tb_align, min_tiles=2)
    TR = TB // g

    def prep(a):
        return _pad2d(a.astype(jnp.float32), Bp, M).reshape(Bp // g, g * M)

    zp, mp, sp = prep(z), prep(mean), prep(log_std)

    vmem = _vmem_limit_bytes(3 * TR * g * M * 4 + TB * 4)

    out = pl.pallas_call(
        partial(_gaussian_logprob_kernel, m=M, g=g),
        out_shape=jax.ShapeDtypeStruct((1, Bp), jnp.float32),
        grid=(G,),
        in_specs=[pl.BlockSpec((TR, g * M), lambda i: (i, 0)) for _ in range(3)],
        out_specs=pl.BlockSpec((1, TB), lambda i: (0, i)),
        compiler_params=pltpu.CompilerParams(
            dimension_semantics=("parallel",),
            vmem_limit_bytes=vmem,
        ),
    )(zp, mp, sp)
    return out.reshape(Bp)[:B]


# ----------------------------------------------------------------------------- modules
class IndependentNormal:
    """Minimal stand-in for td.Independent(td.Normal(mean, std), 1)."""

    def __init__(self, mean, std, log_std):
        self.mean, self.std, self._log_std = mean, std, log_std

    def rsample(self, key):
        # TODO(synk): in-kernel sampling via pltpu.prng_seed/stateful_normal is possible;
        # jax.random is used here since log_prob is the Pallas hot path.
        eps = jax.random.normal(key, self.mean.shape, self.mean.dtype)
        return self.mean + self.std * eps

    sample = rsample

    def log_prob(self, z):
        return gaussian_logprob(z, self.mean, self._log_std)


class MLPEncoderNet:
    """Flatten -> Linear -> ReLU -> Linear -> ReLU -> Linear(2M), fused in one Pallas kernel."""

    def __init__(self, key, in_features, hidden, M, dtype=jnp.float32):
        def init_linear(k, fan_in, fan_out):
            kw, kb = jax.random.split(k)
            bound = 1.0 / math.sqrt(fan_in)
            w = jax.random.uniform(kw, (fan_in, fan_out), dtype, -bound, bound)
            b = jax.random.uniform(kb, (fan_out,), dtype, -bound, bound)
            return w, b

        k1, k2, k3 = jax.random.split(key, 3)
        self.w1, self.b1 = init_linear(k1, in_features, hidden)
        self.w2, self.b2 = init_linear(k2, hidden, hidden)
        self.w3, self.b3 = init_linear(k3, hidden, 2 * M)
        self.M = M

    def encode_gaussian(self, x):
        xf = x.reshape(x.shape[0], -1)
        return gaussian_encode_pallas(xf, self.w1, self.b1, self.w2, self.b2,
                                      self.w3, self.b3, self.M)

    def __call__(self, x):
        mean, _, log_std = self.encode_gaussian(x)
        return jnp.concatenate([mean, log_std], axis=-1)   # (B, 2M), matches the torch net


class GaussianEncoder:
    """JAX/Pallas port of the PyTorch GaussianEncoder module."""

    def __init__(self, encoder_net):
        self.encoder_net = encoder_net

    def __call__(self, x):
        if hasattr(self.encoder_net, "encode_gaussian"):
            mean, std, log_std = self.encoder_net.encode_gaussian(x)   # fused kernel
        else:   # generic encoder_net fallback: chunk + exp on host
            h = self.encoder_net(x)
            M = h.shape[-1] // 2
            mean, log_std = h[:, :M], h[:, M:]
            std = jnp.exp(log_std)
        return IndependentNormal(mean, std, log_std)

    forward = __call__


# ----------------------------------------------------------------------------- demo / check
if __name__ == "__main__":
    key = jax.random.PRNGKey(0)
    B, F1, F2, H, M = 6, 16, 16, 128, 32   # small; B deliberately not a multiple of 8/16

    k_net, k_x, k_z = jax.random.split(key, 3)
    net = MLPEncoderNet(k_net, F1 * F2, H, M)
    encoder = GaussianEncoder(net)

    x = jax.random.normal(k_x, (B, F1, F2), jnp.float32)

    dist = encoder(x)
    jax.block_until_ready(dist.mean)
    jax.block_until_ready(dist.std)

    z = dist.rsample(k_z)
    logp = dist.log_prob(z)
    jax.block_until_ready(logp)

    # ---- pure-JAX reference (mirrors bf16 MXU operands, f32 accumulate) -------
    def q(a):
        return a.astype(jnp.bfloat16).astype(jnp.float32)

    xf = x.reshape(B, -1)
    h = jnp.maximum(q(xf) @ q(net.w1) + net.b1, 0.0)
    h = jnp.maximum(q(h) @ q(net.w2) + net.b2, 0.0)
    h = q(h) @ q(net.w3) + net.b3
    mean_ref, logstd_ref = h[:, :M], h[:, M:]
    std_ref = jnp.exp(logstd_ref)
    u = (z - dist.mean) / dist.std
    logp_ref = jnp.sum(-0.5 * u * u - dist._log_std - _HALF_LOG_2PI, axis=-1)

    assert dist.mean.shape == (B, M) and dist.std.shape == (B, M)
    assert logp.shape == (B,)
    assert jnp.allclose(dist.mean, mean_ref, atol=1e-2, rtol=1e-2)
    assert jnp.allclose(dist.std, std_ref, atol=1e-2, rtol=1e-2)
    assert jnp.allclose(logp, logp_ref, atol=1e-2, rtol=1e-2)

    print("KERNEL_OK")
</pallas_src>

<mosaic_0001>
module attributes {stable_mosaic.version = 11 : i64} {
  func.func @_fused_encoder_kernel(%arg0: i32, %arg1: memref<16x256xbf16, #tpu.memory_space<vmem>>, %arg2: memref<256x128xbf16, #tpu.memory_space<vmem>>, %arg3: memref<1x128xf32, #tpu.memory_space<vmem>>, %arg4: memref<128x128xbf16, #tpu.memory_space<vmem>>, %arg5: memref<1x128xf32, #tpu.memory_space<vmem>>, %arg6: memref<128x32xbf16, #tpu.memory_space<vmem>>, %arg7: memref<1x32xf32, #tpu.memory_space<vmem>>, %arg8: memref<128x32xbf16, #tpu.memory_space<vmem>>, %arg9: memref<1x32xf32, #tpu.memory_space<vmem>>, %arg10: memref<16x32xf32, #tpu.memory_space<vmem>>, %arg11: memref<16x32xf32, #tpu.memory_space<vmem>>, %arg12: memref<16x32xf32, #tpu.memory_space<vmem>>) attributes {dimension_semantics = [#tpu.dimension_semantics<parallel>], iteration_bounds = array<i64: 1>, scalar_prefetch = 0 : i64, scratch_operands = 0 : i64, tpu.core_type = #tpu.core_type<tc>, window_params = [{transform_indices = @transform_0, window_bounds = array<i64: 16, 256>}, {pipeline_mode = #tpu.pipeline_mode<synchronous>, transform_indices = @transform_1, window_bounds = array<i64: 256, 128>}, {pipeline_mode = #tpu.pipeline_mode<synchronous>, transform_indices = @transform_2, window_bounds = array<i64: 1, 128>}, {pipeline_mode = #tpu.pipeline_mode<synchronous>, transform_indices = @transform_3, window_bounds = array<i64: 128, 128>}, {pipeline_mode = #tpu.pipeline_mode<synchronous>, transform_indices = @transform_4, window_bounds = array<i64: 1, 128>}, {pipeline_mode = #tpu.pipeline_mode<synchronous>, transform_indices = @transform_5, window_bounds = array<i64: 128, 32>}, {pipeline_mode = #tpu.pipeline_mode<synchronous>, transform_indices = @transform_6, window_bounds = array<i64: 1, 32>}, {pipeline_mode = #tpu.pipeline_mode<synchronous>, transform_indices = @transform_7, window_bounds = array<i64: 128, 32>}, {pipeline_mode = #tpu.pipeline_mode<synchronous>, transform_indices = @transform_8, window_bounds = array<i64: 1, 32>}, {transform_indices = @transform_9, window_bounds = array<i64: 16, 32>}, {transform_indices = @transform_10, window_bounds = array<i64: 16, 32>}, {transform_indices = @transform_11, window_bounds = array<i64: 16, 32>}]} {
    %c0 = arith.constant 0 : index
    %c0_0 = arith.constant 0 : index
    %0 = vector.load %arg1[%c0, %c0_0] : memref<16x256xbf16, #tpu.memory_space<vmem>>, vector<16x256xbf16>
    %c0_1 = arith.constant 0 : index
    %c0_2 = arith.constant 0 : index
    %1 = vector.load %arg2[%c0_1, %c0_2] : memref<256x128xbf16, #tpu.memory_space<vmem>>, vector<256x128xbf16>
    %cst = arith.constant dense<0.000000e+00> : vector<16x128xf32>
    %2 = tpu.matmul %0, %1, %cst {dimension_numbers = #tpu.dot_dimension_numbers<[1], [0], [0], [1], [0, 0, 1, 1], [], []>} : vector<16x256xbf16>, vector<256x128xbf16>, vector<16x128xf32> -> vector<16x128xf32>
    %c0_3 = arith.constant 0 : index
    %c0_4 = arith.constant 0 : index
    %3 = vector.load %arg3[%c0_3, %c0_4] : memref<1x128xf32, #tpu.memory_space<vmem>>, vector<1x128xf32>
    %4 = vector.broadcast %3 : vector<1x128xf32> to vector<16x128xf32>
    %5 = arith.addf %2, %4 : vector<16x128xf32>
    %cst_5 = arith.constant 0.000000e+00 : f32
    %6 = vector.broadcast %cst_5 : f32 to vector<16x128xf32>
    %7 = arith.maximumf %5, %6 : vector<16x128xf32>
    %8 = arith.truncf %7 : vector<16x128xf32> to vector<16x128xbf16>
    %c0_6 = arith.constant 0 : index
    %c0_7 = arith.constant 0 : index
    %9 = vector.load %arg4[%c0_6, %c0_7] : memref<128x128xbf16, #tpu.memory_space<vmem>>, vector<128x128xbf16>
    %cst_8 = arith.constant dense<0.000000e+00> : vector<16x128xf32>
    %10 = tpu.matmul %8, %9, %cst_8 {dimension_numbers = #tpu.dot_dimension_numbers<[1], [0], [0], [1], [0, 0, 1, 1], [], []>} : vector<16x128xbf16>, vector<128x128xbf16>, vector<16x128xf32> -> vector<16x128xf32>
    %c0_9 = arith.constant 0 : index
    %c0_10 = arith.constant 0 : index
    %11 = vector.load %arg5[%c0_9, %c0_10] : memref<1x128xf32, #tpu.memory_space<vmem>>, vector<1x128xf32>
    %12 = vector.broadcast %11 : vector<1x128xf32> to vector<16x128xf32>
    %13 = arith.addf %10, %12 : vector<16x128xf32>
    %cst_11 = arith.constant 0.000000e+00 : f32
    %14 = vector.broadcast %cst_11 : f32 to vector<16x128xf32>
    %15 = arith.maximumf %13, %14 : vector<16x128xf32>
    %16 = arith.truncf %15 : vector<16x128xf32> to vector<16x128xbf16>
    %c0_12 = arith.constant 0 : index
    %c0_13 = arith.constant 0 : index
    %17 = vector.load %arg6[%c0_12, %c0_13] : memref<128x32xbf16, #tpu.memory_space<vmem>>, vector<128x32xbf16>
    %cst_14 = arith.constant dense<0.000000e+00> : vector<16x32xf32>
    %18 = tpu.matmul %16, %17, %cst_14 {dimension_numbers = #tpu.dot_dimension_numbers<[1], [0], [0], [1], [0, 0, 1, 1], [], []>} : vector<16x128xbf16>, vector<128x32xbf16>, vector<16x32xf32> -> vector<16x32xf32>
    %c0_15 = arith.constant 0 : index
    %c0_16 = arith.constant 0 : index
    %19 = vector.load %arg7[%c0_15, %c0_16] : memref<1x32xf32, #tpu.memory_space<vmem>>, vector<1x32xf32>
    %20 = vector.broadcast %19 : vector<1x32xf32> to vector<16x32xf32>
    %21 = arith.addf %18, %20 : vector<16x32xf32>
    %c0_17 = arith.constant 0 : index
    %c0_18 = arith.constant 0 : index
    %22 = vector.load %arg8[%c0_17, %c0_18] : memref<128x32xbf16, #tpu.memory_space<vmem>>, vector<128x32xbf16>
    %cst_19 = arith.constant dense<0.000000e+00> : vector<16x32xf32>
    %23 = tpu.matmul %16, %22, %cst_19 {dimension_numbers = #tpu.dot_dimension_numbers<[1], [0], [0], [1], [0, 0, 1, 1], [], []>} : vector<16x128xbf16>, vector<128x32xbf16>, vector<16x32xf32> -> vector<16x32xf32>
    %c0_20 = arith.constant 0 : index
    %c0_21 = arith.constant 0 : index
    %24 = vector.load %arg9[%c0_20, %c0_21] : memref<1x32xf32, #tpu.memory_space<vmem>>, vector<1x32xf32>
    %25 = vector.broadcast %24 : vector<1x32xf32> to vector<16x32xf32>
    %26 = arith.addf %23, %25 : vector<16x32xf32>
    %c0_22 = arith.constant 0 : index
    %c0_23 = arith.constant 0 : index
    %27 = vector.load %arg10[%c0_22, %c0_23] : memref<16x32xf32, #tpu.memory_space<vmem>>, vector<16x32xf32>
    tpu.vector_store %arg10[%c0_22, %c0_23], %21 {strides = array<i32>} : memref<16x32xf32, #tpu.memory_space<vmem>>, vector<16x32xf32>,
    %c0_24 = arith.constant 0 : index
    %c0_25 = arith.constant 0 : index
    %28 = vector.load %arg12[%c0_24, %c0_25] : memref<16x32xf32, #tpu.memory_space<vmem>>, vector<16x32xf32>
    tpu.vector_store %arg12[%c0_24, %c0_25], %26 {strides = array<i32>} : memref<16x32xf32, #tpu.memory_space<vmem>>, vector<16x32xf32>,
    %29 = math.exp %26 : vector<16x32xf32>
    %c0_26 = arith.constant 0 : index
    %c0_27 = arith.constant 0 : index
    %30 = vector.load %arg11[%c0_26, %c0_27] : memref<16x32xf32, #tpu.memory_space<vmem>>, vector<16x32xf32>
    tpu.vector_store %arg11[%c0_26, %c0_27], %29 {strides = array<i32>} : memref<16x32xf32, #tpu.memory_space<vmem>>, vector<16x32xf32>,
    return
  }
  func.func @transform_0(%arg0: i32) -> (i32, i32) {
    %c0_i32 = arith.constant 0 : i32
    %c0_i32_0 = arith.constant 0 : i32
    return %arg0, %c0_i32 : i32, i32
  }
  func.func @transform_1(%arg0: i32) -> (i32, i32) {
    %c0_i32 = arith.constant 0 : i32
    %c0_i32_0 = arith.constant 0 : i32
    %c0_i32_1 = arith.constant 0 : i32
    return %c0_i32, %c0_i32_0 : i32, i32
  }
  func.func @transform_2(%arg0: i32) -> (i32, i32) {
    %c0_i32 = arith.constant 0 : i32
    %c0_i32_0 = arith.constant 0 : i32
    %c0_i32_1 = arith.constant 0 : i32
    return %c0_i32, %c0_i32_0 : i32, i32
  }
  func.func @transform_3(%arg0: i32) -> (i32, i32) {
    %c0_i32 = arith.constant 0 : i32
    %c0_i32_0 = arith.constant 0 : i32
    %c0_i32_1 = arith.constant 0 : i32
    return %c0_i32, %c0_i32_0 : i32, i32
  }
  func.func @transform_4(%arg0: i32) -> (i32, i32) {
    %c0_i32 = arith.constant 0 : i32
    %c0_i32_0 = arith.constant 0 : i32
    %c0_i32_1 = arith.constant 0 : i32
    return %c0_i32, %c0_i32_0 : i32, i32
  }
  func.func @transform_5(%arg0: i32) -> (i32, i32) {
    %c0_i32 = arith.constant 0 : i32
    %c0_i32_0 = arith.constant 0 : i32
    %c0_i32_1 = arith.constant 0 : i32
    return %c0_i32, %c0_i32_0 : i32, i32
  }
  func.func @transform_6(%arg0: i32) -> (i32, i32) {
    %c0_i32 = arith.constant 0 : i32
    %c0_i32_0 = arith.constant 0 : i32
    %c0_i32_1 = arith.constant 0 : i32
    return %c0_i32, %c0_i32_0 : i32, i32
  }
  func.func @transform_7(%arg0: i32) -> (i32, i32) {
    %c0_i32 = arith.constant 0 : i32
    %c0_i32_0 = arith.constant 0 : i32
    %c0_i32_1 = arith.constant 0 : i32
    return %c0_i32, %c0_i32_0 : i32, i32
  }
  func.func @transform_8(%arg0: i32) -> (i32, i32) {
    %c0_i32 = arith.constant 0 : i32
    %c0_i32_0 = arith.constant 0 : i32
    %c0_i32_1 = arith.constant 0 : i32
    return %c0_i32, %c0_i32_0 : i32, i32
  }
  func.func @transform_9(%arg0: i32) -> (i32, i32) {
    %c0_i32 = arith.constant 0 : i32
    %c0_i32_0 = arith.constant 0 : i32
    return %arg0, %c0_i32 : i32, i32
  }
  func.func @transform_10(%arg0: i32) -> (i32, i32) {
    %c0_i32 = arith.constant 0 : i32
    %c0_i32_0 = arith.constant 0 : i32
    return %arg0, %c0_i32 : i32, i32
  }
  func.func @transform_11(%arg0: i32) -> (i32, i32) {
    %c0_i32 = arith.constant 0 : i32
    %c0_i32_0 = arith.constant 0 : i32
    return %arg0, %c0_i32 : i32, i32
  }
}

</mosaic_0001>

<bundles_post_ra>
// kernel: tpu_custom_call.1
= control target key start
LH: loop header
LB: loop body
LE: loop exit
PB: predicated region body
PF: predicated region fallthrough
CT: control target
= control target key end

     0   :  { %17 = vsyncpa [#allocation3], 0  ;;  %s1076_s0 = inlined_call_operand.vmem [shape: bf16[16,256], index: 0, kind: input, shape index: {}]   ;;  %s1077_s1 = inlined_call_operand.vmem [shape: bf16[256,128], index: 1, kind: input, shape index: {}]   ;;  %s1078_s2 = inlined_call_operand.vmem [shape: f32[1,128], index: 2, kind: input, shape index: {}]   ;;  %s1079_s3 = inlined_call_operand.hbm [shape: bf16[128,128], index: 3, kind: input, shape index: {}]   ;;  %s1080_s4 = inlined_call_operand.vmem [shape: f32[1,128], index: 4, kind: input, shape index: {}]   ;;  %s1081_s5 = inlined_call_operand.vmem [shape: bf16[128,32], index: 5, kind: input, shape index: {}]   ;;  %s1082_s6 = inlined_call_operand.vmem [shape: f32[1,32], index: 6, kind: input, shape index: {}]   ;;  %s1083_s7 = inlined_call_operand.vmem [shape: bf16[128,32], index: 7, kind: input, shape index: {}]   ;;  %s1084_s8 = inlined_call_operand.vmem [shape: f32[1,32], index: 8, kind: input, shape index: {}]   ;;  %s1085_s9 = inlined_call_operand.hbm [shape: f32[16,32], index: 9, kind: output, shape index: {0}]   ;;  %s1086_s10 = inlined_call_operand.hbm [shape: f32[16,32], index: 10, kind: output, shape index: {1}]   ;;  %s1087_s11 = inlined_call_operand.hbm [shape: f32[16,32], index: 11, kind: output, shape index: {2}]  }
   0x1   :  { %18 = vsyncpa [#allocation4], 0 }
   0x2   :  { %19 = vsyncpa [#allocation7], 0  ;;  %s30_s19 = sshll.u32 %s1079_s3, 4  ;;  %s870_s20 = smov [#allocation2]   ;;  %s31_s19 = int_to_ptr.hbm [resolvable:$true] %s30_s19 }
   0x3   :  { %s32_s21 = sshll.u32 %s870_s20, 4  ;;  %s871_s22 = smov 64   ;;  %s33_s21 = int_to_ptr.vmem [resolvable:$true] %s32_s21 }
   0x4   :  { %s872_s23 = smov 4  }
   0x5   :  { %38 = dma.hbm_to_vmem [thread:$0]  %s31_s19, 1024, %s33_s21, [#allocation3], %s871_s22, %s871_s22, %s872_s23  }
   0x6   :  { %864 = dma.done.wait [#allocation3], 1024  }
   0x7   :  { %865 = vsyncadd [#allocation3], 4294966272  ;;  %v719_v0 = vld [vmem:[%s1077_s1 + $0x38] sm:$0xff]  ;;  %v718_v2 = vld [vmem:[%s1077_s1 + $0x30] sm:$0xff]  ;;  %vm477_vm0 = vcmask 261120   ;;  %s874_s17 = smov [#allocation5]  }
   0x8   :  { %v727_v1 = vld [vmem:[%s1077_s1 + $0x78] sm:$0xff]  ;;  %197 = vmatpush.bf16.msra.mxu0 %v719_v0  ;;  %v726_v3 = vld [vmem:[%s1077_s1 + $0x70] sm:$0xff]  ;;  %v717_v4 = vld [vmem:[%s1077_s1 + $0x28] sm:$0xff]  ;;  %s492_s18 = sshll.u32 %s874_s17, 4  ;;  %s507_s23 = sshll.u32 %s1086_s10, 4  ;;  %s493_s18 = int_to_ptr.vmem [resolvable:$true] %s492_s18  ;;  %s508_s23 = int_to_ptr.hbm [resolvable:$true] %s507_s23 }
   0x9   :  { %211 = vmatpush.bf16.msra.mxu1 %v727_v1  ;;  %v725_v5 = vld [vmem:[%s1077_s1 + $0x68] sm:$0xff]  ;;  %v735_v6 = vld [vmem:[#allocation2 + $0x38] sm:$0xff]  ;;  %v734_v7 = vld [vmem:[#allocation2 + $0x30] sm:$0xff]  ;;  %s877_s26 = smov 8  }
   0xa   :  { %296 = vmatpush.bf16.msra.mxu2 %v735_v6  ;;  %v716_v8 = vld [vmem:[%s1077_s1 + $0x20] sm:$0xff]  ;;  %v733_v10 = vld [vmem:[#allocation2 + $0x28] sm:$0xff]  ;;  %v715_v11 = vld [vmem:[%s1077_s1 + $0x18] sm:$0xff] }
   0xb   :  { %v724_v9 = vld [vmem:[%s1077_s1 + $0x60] sm:$0xff]  ;;  %v723_v12 = vld [vmem:[%s1077_s1 + $0x58] sm:$0xff]  ;;  %v714_v14 = vld [vmem:[%s1077_s1 + $0x10] sm:$0xff] }
   0xc   :  { %198 = vmatpush.bf16.msra.mxu0 %v718_v2  ;;  %v732_v13 = vld [vmem:[#allocation2 + $0x20] sm:$0xff]  ;;  %v722_v15 = vld [vmem:[%s1077_s1 + $0x50] sm:$0xff]  ;;  %v713_v16 = vld [vmem:[%s1077_s1 + $0x8] sm:$0xff] }
   0xd   :  { %212 = vmatpush.bf16.msra.mxu1 %v726_v3  ;;  %v721_v17 = vld [vmem:[%s1077_s1 + $0x48] sm:$0xff]  ;;  %v712_v18 = vld [vmem:[%s1077_s1] sm:$0xff]  ;;  %v731_v26 = vld [vmem:[#allocation2 + $0x18] sm:$0xff] }
   0xe   :  { %297 = vmatpush.bf16.msra.mxu2 %v734_v7  ;;  %v720_v19 = vld [vmem:[%s1077_s1 + $0x40] sm:$0xff]  ;;  %v711_v21 = vld [vmem:[%s1076_s0 + $0x4] sm:$0xf0]  ;;  %v546_v23 = vld [vmem:[%s1076_s0 + $0x8] sm:$0xf0] }
   0xf   :  { %v544_v20 = vld [vmem:[%s1076_s0] sm:$0xf]  ;;  %v710_v22 = vld [vmem:[%s1076_s0 + $0x4] sm:$0xf]  ;;  %v730_v27 = vld [vmem:[#allocation2 + $0x10] sm:$0xff]  ;;  %s520_s0 = sshll.u32 %s1087_s11, 4  ;;  %s521_s0 = int_to_ptr.hbm [resolvable:$true] %s520_s0 }
  0x10   :  { %199 = vmatpush.bf16.msra.mxu0 %v717_v4  ;;  %v545_v24 = vor.u32 %v711_v21, %v544_v20  ;;  %v549_v25 = vor.u32 %v710_v22, %v546_v23  ;;  %v729_v28 = vld [vmem:[#allocation2 + $0x8] sm:$0xff]  ;;  %v728_v29 = vld [vmem:[#allocation2] sm:$0xff]  ;;  %v743_v30 = vld [vmem:[%s1081_s5 + $0x38] sm:$0xff] }
  0x11   :  { %213 = vmatpush.bf16.msra.mxu1 %v725_v5  ;;  %v751_v31 = vld [vmem:[%s1083_s7 + $0x38] sm:$0xff]  ;;  %381 = vmatpush.bf16.msra.mxu3 %v743_v30  ;;  %v742_v32 = vld [vmem:[%s1081_s5 + $0x30] sm:$0xff]  ;;  %v741_v34 = vld [vmem:[%s1081_s5 + $0x28] sm:$0xff] }
  0x12   :  { %298 = vmatpush.bf16.msra.mxu2 %v733_v10  ;;  %v750_v33 = vld [vmem:[%s1083_s7 + $0x30] sm:$0xff]  ;;  %v749_v35 = vld [vmem:[%s1083_s7 + $0x28] sm:$0xff]  ;;  %v740_v36 = vld [vmem:[%s1081_s5 + $0x20] sm:$0xff] }
  0x13   :  { %v748_v37 = vld [vmem:[%s1083_s7 + $0x20] sm:$0xff]  ;;  %v739_v50 = vld [vmem:[%s1081_s5 + $0x18] sm:$0xff]  ;;  %v738_v52 = vld [vmem:[%s1081_s5 + $0x10] sm:$0xff] }
  0x14   :  { %200 = vmatpush.bf16.msra.mxu0 %v716_v8  ;;  %v760_v40 = vld [vmem:[%s1078_s2] ss:$0 sm:$0xff]  ;;  %v747_v51 = vld [vmem:[%s1083_s7 + $0x18] sm:$0xff]  ;;  %v746_v53 = vld [vmem:[%s1083_s7 + $0x10] sm:$0xff]  ;;  %s875_s2 = smov [#allocation8]  }
  0x15   :  { %214 = vmatpush.bf16.msra.mxu1 %v724_v9  ;;  %382 = vmatpush.bf16.msra.mxu3 %v742_v32  ;;  %v737_v54 = vld [vmem:[%s1081_s5 + $0x8] sm:$0xff]  ;;  %v736_v56 = vld [vmem:[%s1081_s5] sm:$0xff]  ;;  %s518_s1 = sshll.u32 %s875_s2, 4  ;;  %s519_s1 = int_to_ptr.vmem [resolvable:$true] %s518_s1 }
  0x16   :  { %299 = vmatpush.bf16.msra.mxu2 %v732_v13  ;;  %v745_v55 = vld [vmem:[%s1083_s7 + $0x8] sm:$0xff]  ;;  %v744_v57 = vld [vmem:[%s1083_s7] sm:$0xff] }
  0x17   :  { %v761_v59 = vld [vmem:[%s1080_s4] ss:$0 sm:$0xff] }
  0x18   :  { %201 = vmatpush.bf16.msra.mxu0 %v715_v11  ;;  %v762_v2 = vld [vmem:[%s1084_s8] ss:$0 sm:$0xff]  ;;  %s873_s8 = smov [#allocation6]  }
  0x19   :  { %215 = vmatpush.bf16.msra.mxu1 %v723_v12  ;;  %383 = vmatpush.bf16.msra.mxu3 %v741_v34  ;;  %v763_v6 = vld [vmem:[%s1082_s6] ss:$0 sm:$0xff]  ;;  %s505_s16 = sshll.u32 %s873_s8, 4  ;;  %s494_s6 = sshll.u32 %s1085_s9, 4  ;;  %s495_s6 = int_to_ptr.hbm [resolvable:$true] %s494_s6  ;;  %s506_s16 = int_to_ptr.vmem [resolvable:$true] %s505_s16 }
  0x1a   :  { %300 = vmatpush.bf16.msra.mxu2 %v731_v26  ;;  %s876_s9 = smov 128  }
  0x1c   :  { %202 = vmatpush.bf16.msra.mxu0 %v714_v14 }
  0x1d   :  { %216 = vmatpush.bf16.msra.mxu1 %v722_v15  ;;  %384 = vmatpush.bf16.msra.mxu3 %v740_v36 }
  0x1e   :  { %301 = vmatpush.bf16.msra.mxu2 %v730_v27 }
  0x20   :  { %203 = vmatpush.bf16.msra.mxu0 %v713_v16 }
  0x21   :  { %217 = vmatpush.bf16.msra.mxu1 %v721_v17  ;;  %385 = vmatpush.bf16.msra.mxu3 %v739_v50 }
  0x22   :  { %302 = vmatpush.bf16.msra.mxu2 %v729_v28 }
  0x24   :  { %204 = vmatpush.bf16.msra.mxu0 %v712_v18 }
  0x25   :  { %218 = vmatpush.bf16.msra.mxu1 %v720_v19  ;;  %386 = vmatpush.bf16.msra.mxu3 %v738_v52 }
  0x26   :  { %303 = vmatpush.bf16.msra.mxu2 %v728_v29 }
  0x27   :  { %205 = vmatmul.bf16.vlgmr.msra.gmra.mxu0 %v545_v24 }
  0x28   :  { %219 = vmatmul.bf16.vlgmr.msra.gmra.mxu1 %v549_v25  ;;  %463 = vmatpush.bf16.msrb.mxu0 %v751_v31 }
  0x29   :  { %387 = vmatpush.bf16.msra.mxu3 %v737_v54 }
  0x2c   :  { %464 = vmatpush.bf16.msrb.mxu0 %v750_v33 }
  0x2d   :  { %388 = vmatpush.bf16.msra.mxu3 %v736_v56 }
  0x30   :  { %465 = vmatpush.bf16.msrb.mxu0 %v749_v35 }
  0x34   :  { %466 = vmatpush.bf16.msrb.mxu0 %v748_v37 }
  0x38   :  { %467 = vmatpush.bf16.msrb.mxu0 %v747_v51 }
  0x3c   :  { %468 = vmatpush.bf16.msrb.mxu0 %v746_v53 }
  0x40   :  { %469 = vmatpush.bf16.msrb.mxu0 %v745_v55 }
  0x44   :  { %470 = vmatpush.bf16.msrb.mxu0 %v744_v57 }
  0xa4   :  { %v206_v38 = vpop.f32.mrf.mxu0 }
  0xa5   :  { %v220_v39 = vpop.f32.mrf.mxu1  ;;  %v207_v41 = vadd.f32 %v760_v40, %v206_v38 }
  0xa7   :  { %v221_v43 = vadd.f32 %v220_v39, %v207_v41 }
  0xa9   :  { %v225_v47 = vmax.f32 %v221_v43, 0.0 }
  0xac   :  { %v208_v42 = vpop.f32.mrf.mxu0 }
  0xad   :  { %v209_v44 = vadd.f32 %v760_v40, %v208_v42  ;;  %v222_v45 = vpop.f32.mrf.mxu1 }
  0xaf   :  { %v223_v46 = vadd.f32 %v222_v45, %v209_v44 }
  0xb1   :  { %v226_v48 = vmax.f32 %v223_v46, 0.0 }
  0xb3   :  { %v227_v49 = vpack.c.bf16 %v226_v48, %v225_v47 }
  0xb5   :  { %304 = vmatmul.bf16.vlgmr.msra.gmra.mxu2 %v227_v49 }
 0x138   :  { %v305_v58 = vpop.f32.mrf.mxu2 }
 0x139   :  { %v306_v60 = vadd.f32 %v761_v59, %v305_v58 }
 0x13b   :  { %v310_v63 = vmax.f32 %v306_v60, 0.0 }
 0x140   :  { %v307_v61 = vpop.f32.mrf.mxu2 }
 0x141   :  { %v308_v62 = vadd.f32 %v761_v59, %v307_v61 }
 0x143   :  { %v311_v0 = vmax.f32 %v308_v62, 0.0 }
 0x145   :  { %v312_v1 = vpack.c.bf16 %v311_v0, %v310_v63 }
 0x147   :  { %389 = vmatmul.bf16.vlgmr.msra.gmra.mxu3 %v312_v1  ;;  %471 = vmatmul.bf16.vlgmr.msrb.gmra.mxu0 %v312_v1 }
 0x1c4   :  { %v472_v3 = vpop.f32.mrf.mxu0 }
 0x1c5   :  { %v473_v4 = vadd.f32 %v762_v2, %v472_v3 }
 0x1c7   :  { %480 = vst.msk [vmem:[#allocation8] sm:$0xff] %vm477_vm0, %v473_v4  ;;  %v482_v5 = vmul.f32 1.442695, %v473_v4 }
 0x1c9   :  { %764 = vpow2.f32 %v482_v5 }
 0x1ca   :  { %v390_v7 = vpop.f32.mrf.mxu3 }
 0x1cb   :  { %v391_v8 = vadd.f32 %v763_v6, %v390_v7 }
 0x1cc   :  { %v474_v9 = vpop.f32.mrf.mxu0 }
 0x1cd   :  { %478 = vst.msk [vmem:[#allocation5] sm:$0xff] %vm477_vm0, %v391_v8  ;;  %v475_v10 = vadd.f32 %v762_v2, %v474_v9 }
 0x1cf   :  { %v765_v11 = vpop.eup %764  ;;  %481 = vst.msk [vmem:[#allocation8 + $0x8] sm:$0xff] %vm477_vm0, %v475_v10  ;;  %v484_v12 = vmul.f32 1.442695, %v475_v10 }
 0x1d0   :  { %486 = vst.msk [vmem:[#allocation6] sm:$0xff] %vm477_vm0, %v765_v11 }
 0x1d1   :  { %766 = vpow2.f32 %v484_v12 }
 0x1d2   :  { %v392_v13 = vpop.f32.mrf.mxu3 }
 0x1d3   :  { %v393_v14 = vadd.f32 %v763_v6, %v392_v13 }
 0x1d5   :  { %479 = vst.msk [vmem:[#allocation5 + $0x8] sm:$0xff] %vm477_vm0, %v393_v14 }
 0x1d6   :  { %500 = dma.vmem_to_hbm [thread:$0]  %s493_s18, 256, %s495_s6, [#allocation4], %s876_s9, %s876_s9, %s877_s26  }
 0x1d7   :  { %v767_v15 = vpop.eup %766 }
 0x1d8   :  { %487 = vst.msk [vmem:[#allocation6 + $0x8] sm:$0xff] %vm477_vm0, %v767_v15 }
 0x1d9   :  { %513 = dma.vmem_to_hbm [thread:$0]  %s506_s16, 256, %s508_s23, [#allocation7], %s876_s9, %s876_s9, %s877_s26  }
 0x1da   :  { %526 = dma.vmem_to_hbm [thread:$0]  %s519_s1, 256, %s521_s0, [#allocation7], %s876_s9, %s876_s9, %s877_s26  }
 0x1db   :  { %866 = dma.done.wait [#allocation4], 256  }
 0x1dc   :  { %867 = vsyncadd [#allocation4], 4294967040 }
 0x1dd   :  { %868 = dma.done.wait [#allocation7], 512  }
 0x1de   :  { %869 = vsyncadd [#allocation7], 4294966784 }
 0x1df   :  { %539 = vsyncpa [#allocation3], 1 }
 0x1e0   :  { %540 = vsyncpa [#allocation4], 1 }
 0x1e1   :  { %541 = vsyncpa [#allocation7], 1 }

</bundles_post_ra>
